<compile_context>
chip_gen: v6e
topology: v6e:2x2x1
jax: 0.10.0
libtpu: 0.0.40
codegen_flags: <defaults>
</compile_context>

<pallas_src>
import math

import jax
import jax.numpy as jnp
from jax.experimental import pallas as pl
from jax.experimental.pallas import tpu as pltpu

# Lane-dense column widths to try (all multiples of 128); widest first.
_LANE_WIDTHS = (1024, 512, 256, 128)
# Target elements per grid tile (~1M elems -> <= 12 MiB double-buffered for
# bf16 in / f32 out; <= 16 MiB for 4-byte inputs).
_BLOCK_ELEMS = 1024 * 1024
# Below this many elements a fused XLA convert beats the kernel launch.
_SMALL_FALLBACK_ELEMS = 256 * 1024
# Explicit scoped-VMEM budget: covers the largest tile with headroom and is
# safe on every generation (v5e/v6e: 128 MiB physical, v7x: 64 MiB physical).
_VMEM_LIMIT_BYTES = 32 * 1024 * 1024


def _tofp32_kernel(x_ref, o_ref):
    # Pure elementwise dtype cast on the VPU: load tile, cast, store.
    o_ref[...] = x_ref[...].astype(jnp.float32)


def _round_up(n, m):
    return ((n + m - 1) // m) * m


def _sublane_granule(itemsize):
    # Minimum second-minor block granularity per element width.
    if itemsize >= 4:
        return 8
    if itemsize == 2:
        return 16
    if itemsize == 1:
        return 32
    return 64  # sub-byte dtypes (int4 / fp4-style): be conservative.


def tofp32(x):
    """Cast any-dtype array to float32 (torch `input.float()` semantics)."""
    x = jnp.asarray(x)
    if x.dtype == jnp.float32:
        # Already fp32: .float() is a no-op; skip the HBM round trip.
        return x

    orig_shape = x.shape
    total = math.prod(orig_shape) if orig_shape else 1

    if total < _SMALL_FALLBACK_ELEMS:
        # Tiny tensors: per-step / launch / repack overhead dominates.
        return x.astype(jnp.float32)

    itemsize = jnp.dtype(x.dtype).itemsize
    g = _sublane_granule(itemsize)

    # Widest lane-dense width that divides the element count -> free reshape,
    # no pad, no post-slice.
    lanes = None
    for cand in _LANE_WIDTHS:
        if total % cand == 0:
            lanes = cand
            break

    flat = x.reshape(-1)
    if lanes is None:
        # Ragged element count: pad by < 1024 elements; the pad producer is
        # fused into the input DMA (allow_input_fusion) so it costs no extra
        # HBM round trip.
        lanes = _LANE_WIDTHS[0]
        padded_total = _round_up(total, lanes)
        flat = jnp.pad(flat, (0, padded_total - total))
        padded = True
    else:
        padded_total = total
        padded = False

    rows = padded_total // lanes

    # Row tile: target ~_BLOCK_ELEMS elements per tile, but keep >= ~8 grid
    # steps so the DMA pipeline overlaps and both v7x TensorCores get work.
    max_row_block = max(g, _BLOCK_ELEMS // lanes)
    row_block = _round_up(pl.cdiv(rows, 8), g)
    row_block = min(row_block, max_row_block)
    grid = (pl.cdiv(rows, row_block),)  # ragged last block is masked by Pallas

    out = pl.pallas_call(
        _tofp32_kernel,
        out_shape=jax.ShapeDtypeStruct((rows, lanes), jnp.float32),
        grid_spec=pl.GridSpec(
            grid=grid,
            in_specs=[pl.BlockSpec((row_block, lanes), lambda i: (i, 0))],
            out_specs=pl.BlockSpec((row_block, lanes), lambda i: (i, 0)),
        ),
        compiler_params=pltpu.CompilerParams(
            dimension_semantics=("parallel",),
            vmem_limit_bytes=_VMEM_LIMIT_BYTES,
            allow_input_fusion=[True] if padded else None,
        ),
        cost_estimate=pl.CostEstimate(
            flops=0,
            transcendentals=0,
            # True (unpadded) traffic: itemsize bytes in, 4 bytes out per elem.
            bytes_accessed=total * (itemsize + 4),
        ),
    )(flat.reshape(rows, lanes))

    out_flat = out.reshape(-1)
    if padded:
        out_flat = out_flat[:total]
    return out_flat.reshape(orig_shape)


if __name__ == "__main__":
    key = jax.random.PRNGKey(0)
    keys = jax.random.split(key, 5)

    # 1) Small NCHW input (module's typical shape) -> astype fast path.
    x_small = jax.random.normal(keys[0], (2, 4, 16, 16),
                                dtype=jnp.float32).astype(jnp.bfloat16)
    y_small = jax.block_until_ready(tofp32(x_small))
    assert y_small.dtype == jnp.float32 and y_small.shape == x_small.shape
    assert jnp.array_equal(y_small, x_small.astype(jnp.float32))

    # 2) Medium bf16 tensor, element count divisible by 1024 -> kernel path,
    #    zero pad / zero post-slice.
    x_bf16 = jax.random.normal(keys[1], (4, 32, 64, 32),
                               dtype=jnp.float32).astype(jnp.bfloat16)
    y_bf16 = jax.block_until_ready(tofp32(x_bf16))
    assert y_bf16.dtype == jnp.float32 and y_bf16.shape == x_bf16.shape
    assert jnp.array_equal(y_bf16, x_bf16.astype(jnp.float32))

    # 3) Ragged element count (not a multiple of 128) -> fused-pad kernel path.
    x_ragged = jax.random.normal(keys[2], (1, 3, 297, 298),
                                 dtype=jnp.float32).astype(jnp.bfloat16)
    y_ragged = jax.block_until_ready(tofp32(x_ragged))
    assert y_ragged.dtype == jnp.float32 and y_ragged.shape == x_ragged.shape
    assert jnp.array_equal(y_ragged, x_ragged.astype(jnp.float32))

    # 4) Integer input (4-byte itemsize) through the kernel path.
    x_int32 = jax.random.randint(keys[3], (4, 32, 64, 32), -100, 100,
                                 dtype=jnp.int32)
    y_int32 = jax.block_until_ready(tofp32(x_int32))
    assert y_int32.dtype == jnp.float32 and y_int32.shape == x_int32.shape
    assert jnp.array_equal(y_int32, x_int32.astype(jnp.float32))

    # 5) Already-fp32 short-circuit path.
    x_fp32 = jax.random.normal(keys[4], (2, 3, 8, 8), dtype=jnp.float32)
    y_fp32 = jax.block_until_ready(tofp32(x_fp32))
    assert y_fp32.dtype == jnp.float32
    assert jnp.array_equal(y_fp32, x_fp32)

    print("KERNEL_OK")
</pallas_src>

<mosaic_0001>
module attributes {stable_mosaic.version = 11 : i64} {
  func.func @_tofp32_kernel(%arg0: i32, %arg1: memref<32x1024xbf16, #tpu.memory_space<vmem>>, %arg2: memref<32x1024xf32, #tpu.memory_space<vmem>>) attributes {dimension_semantics = [#tpu.dimension_semantics<parallel>], iteration_bounds = array<i64: 8>, scalar_prefetch = 0 : i64, scratch_operands = 0 : i64, tpu.core_type = #tpu.core_type<tc>, window_params = [{transform_indices = @transform_0, window_bounds = array<i64: 32, 1024>}, {transform_indices = @transform_1, window_bounds = array<i64: 32, 1024>}]} {
    %c0 = arith.constant 0 : index
    %c0_0 = arith.constant 0 : index
    %0 = vector.load %arg1[%c0, %c0_0] : memref<32x1024xbf16, #tpu.memory_space<vmem>>, vector<32x1024xbf16>
    %1 = arith.extf %0 : vector<32x1024xbf16> to vector<32x1024xf32>
    %c0_1 = arith.constant 0 : index
    %c0_2 = arith.constant 0 : index
    %2 = vector.load %arg2[%c0_1, %c0_2] : memref<32x1024xf32, #tpu.memory_space<vmem>>, vector<32x1024xf32>
    tpu.vector_store %arg2[%c0_1, %c0_2], %1 {strides = array<i32>} : memref<32x1024xf32, #tpu.memory_space<vmem>>, vector<32x1024xf32>,
    return
  }
  func.func @transform_0(%arg0: i32) -> (i32, i32) {
    %c0_i32 = arith.constant 0 : i32
    %c0_i32_0 = arith.constant 0 : i32
    return %arg0, %c0_i32 : i32, i32
  }
  func.func @transform_1(%arg0: i32) -> (i32, i32) {
    %c0_i32 = arith.constant 0 : i32
    %c0_i32_0 = arith.constant 0 : i32
    return %arg0, %c0_i32 : i32, i32
  }
}

</mosaic_0001>

<bundles_post_ra>
// kernel: tpu_custom_call.1
= control target key start
LH: loop header
LB: loop body
LE: loop exit
PB: predicated region body
PF: predicated region fallthrough
CT: control target
= control target key end

     0   :  { %6 = vsyncpa [#allocation3], 0  ;;  %s692_s0 = inlined_call_operand.hbm [shape: bf16[256,1024], index: 0, kind: input, shape index: {}]   ;;  %s693_s1 = inlined_call_operand.hbm [shape: f32[256,1024], index: 1, kind: output, shape index: {}]  }
   0x1   :  { %8 = vsyncpa [#allocation3 + $0x1], 0 }
   0x2   :  { %9 = vsyncpa [#allocation4], 0 }
   0x3   :  { %11 = vsyncpa [#allocation4 + $0x1], 0  ;;  %s486_s6 = smov 0   ;;  %s488_s7 = smov 0  }
   0x4   :  { %s490_s8 = smov 0   ;;  %s492_s9 = smov 0  }
   0x5 LB: > { %s507_s10 = sadd.s32 4294967295, %s468_s9   ;;  %s306_s11 = sadd.s32 4294967294, %s468_s9   ;;  %s468_s9 = sphi %s492_s9, %s707_s9   ;;  %s464_s8 = sphi %s490_s8, %s706_s8   ;;  %s460_s7 = sphi %s488_s7, %s705_s7   ;;  %s456_s6 = sphi %s486_s6, %s704_s6  }
   0x6   : > { %s511_s12 = sadd.s32 1, %s468_s9   ;;  %s24_s13 = sadd.s32 1, %s464_s8 }
   0x7   : > { %s21_s14 = ssub.s32 %s468_s9, %s511_s12  ;;  %p31_p0 = scmp.ne.s32.totalorder %s464_s8, %s460_s7 }
   0x8   : > { %p22_p1 = scmp.eq.s32.totalorder %s21_s14, 0  ;;  %p32_p2 = scmp.eq.s32.totalorder %s468_s9, 0 }
   0x9   : > { %p37_p3 = scmp.ne.s32.totalorder %s460_s7, %s456_s6  ;;  %p38_p4 = scmp.eq.s32.totalorder %s507_s10, 0 }
   0xa   : > { %s523_s15 = scalar_select %p22_p1, %s464_s8, %s24_s13  }
   0xb   : > { %p525_p5 = por %p32_p2, %p31_p0  ;;  %p529_p6 = por %p38_p4, %p37_p3 }
   0xc   : > { %p61_p7 = scmp.eq.s32.totalorder %s507_s10, 7  ;;  %p67_p8 = scmp.eq.s32.totalorder %s306_s11, 7 }
   0xd   : > { %s697_s17 = scalar_select %p529_p6, 1, 0 }
   0xe   : > { %p338_p9 = scmp.lt.s32.totalorder %s468_s9, 8  ;;  %p535_p10 = por %p61_p7, %p31_p0 }
   0xf   : > { %p539_p11 = por %p67_p8, %p37_p3  ;;  %s87_s20 = sand.u32 1, %s464_s8  }
  0x10   : > { %s698_s18 = scalar_select %p535_p10, 1, 0 }
  0x11   : > { %s699_s19 = scalar_select %p539_p11, 1, 0 }
  0x12   : > { %s323_s21 = sshll.u32 %s468_s9, 11  ;;  %s309_s22 = sshll.u32 %s87_s20, 7 }
  0x13   : > { %s548_s25 = scalar_lea.hbm %s692_s0, %s323_s21  ;;  %s91_s26 = scalar_lea.vmem [#allocation2], %s309_s22 }
  0x14   : > { %s99_s27 = sshll.u32 %s91_s26, 4  ;;  %p552_p12 = pnand %p338_p9, %p525_p5  ;;  %s556_s27 = int_to_ptr.vmem [resolvable:$true] %s99_s27 }
  0x15   : > { %s558_s29 = scalar_lea.sflag [#allocation3], %s87_s20  ;;  %s376_s30 = scalar_lea.hbm %s548_s25, 2048 }
  0x16   : > { %p377_p13 = scmp.ne.s32.totalorder %s548_s25, %s376_s30  ;;  %p378_p0 = pneg %p552_p12 }
  0x17   : > { %s381_s4 = scalar_lea.hbm %s692_s0, 16384  ;;  %p382_p3 = scmp.lt.s32.totalorder %s548_s25, %s692_s0 }
  0x18   : > { %p379_p1 = pnand %p378_p0, %p377_p13  ;;  %p383_p4 = scmp.lt.s32.totalorder %s381_s4, %s376_s30 }
  0x1a   : > { %p380_p2 = pneg %p379_p1  ;;  %p384_p5 = por %p383_p4, %p382_p3 }
  0x1c   : > { %p385_p7 = pnand %p384_p5, %p380_p2 }
  0x1e   : > { %388 = shalt.err (!%p385_p7)
}
  0x1f   : > { %s389_s13 = scalar_lea.vmem %s556_s27, 2048  ;;  %s470_s14 = smov [#allocation2]  }
  0x20   : > { %p390_p8 = scmp.ne.s32.totalorder %s556_s27, %s389_s13  ;;  %s394_s16 = sshll.u32 %s470_s14, 4  ;;  %s395_s16 = int_to_ptr.vmem [resolvable:$false] %s394_s16 }
  0x21   : > { %s396_s20 = scalar_lea.vmem %s395_s16, 4096  ;;  %p397_p1 = scmp.lt.s32.totalorder %s556_s27, %s395_s16 }
  0x22   : > { %p392_p9 = pnand %p390_p8, %p378_p0  ;;  %p398_p11 = scmp.lt.s32.totalorder %s396_s20, %s389_s13 }
  0x24   : > { %p393_p13 = pneg %p392_p9  ;;  %p399_p10 = por %p398_p11, %p397_p1 }
  0x26   : > { %p400_p6 = pnand %p399_p10, %p393_p13 }
  0x28   : > { %403 = shalt.err (!%p400_p6)
}
  0x29   : > { %s471_s21 = smov 512   ;;  %s472_s22 = smov 32  }
  0x2a   : > { %333 = dma.hbm_to_vmem [thread:$0]  (!%p552_p12), %s548_s25, 2048, %s556_s27, %s558_s29, %s471_s21, %s471_s21, %s472_s22  }
  0x2b   : > { %p313_p0 = scmp.ge.s32.totalorder %s468_s9, 1  ;;  %p107_p2 = scmp.lt.s32.totalorder %s468_s9, 9 }
  0x2d   : > { %p108_p3 = pnand %p313_p0, %p107_p2 }
  0x2e   : > { %s582_s23 = sand.u32 (!%p108_p3), 1, %s460_s7   ;;  %p701_p6 = scmp.ne.s32.totalorder (!%p108_p3), %s697_s17, 0 }
  0x2f   : > { %111 = sbr.rel (%p108_p3) target bundleno = 85 (0x55), region = 24  ;;  %s314_s24 = sshll.u32 (!%p108_p3), %s582_s23, 7 }
  0x30   : > { %s114_s26 = scalar_lea.sflag (!%p108_p3), [#allocation3], %s582_s23  ;;  %s586_s30 = scalar_lea.vmem (!%p108_p3), [#allocation2], %s314_s24 }
  0x34   : > { %447 = dma.done.wait (%p701_p6), %s114_s26, 2048  }
  0x35   : > { %449 = vsyncadd (%p701_p6), %s114_s26, 4294965248  ;;  %s315_s25 = sshll.u32 %s582_s23, 8  ;;  %v138_v0 = vld [vmem:[%s586_s30] sm:$0xff]  ;;  %v139_v1 = vld [vmem:[%s586_s30 + $0x8] sm:$0xff]  ;;  %s325_s27 = sshll.u32 %s507_s10, 12 }
  0x36   : > { %v140_v2 = vld [vmem:[%s586_s30 + $0x10] sm:$0xff]  ;;  %v154_v3 = vunpack.c.l.bf16 %v138_v0  ;;  %v155_v4 = vunpack.c.h.bf16 %v138_v0  ;;  %v156_v5 = vunpack.c.l.bf16 %v139_v1  ;;  %v157_v6 = vunpack.c.h.bf16 %v139_v1  ;;  %v141_v7 = vld [vmem:[%s586_s30 + $0x18] sm:$0xff]  ;;  %v142_v8 = vld [vmem:[%s586_s30 + $0x20] sm:$0xff]  ;;  %s602_s17 = scalar_lea.vmem [#allocation5], %s315_s25  ;;  %s636_s2 = scalar_lea.hbm %s693_s1, %s325_s27 }
  0x37   : > { %v143_v9 = vld [vmem:[%s586_s30 + $0x28] sm:$0xff]  ;;  %v158_v10 = vunpack.c.l.bf16 %v140_v2  ;;  %v159_v11 = vunpack.c.h.bf16 %v140_v2  ;;  %v160_v12 = vunpack.c.l.bf16 %v141_v7  ;;  %v161_v13 = vunpack.c.h.bf16 %v141_v7  ;;  %v144_v14 = vld [vmem:[%s586_s30 + $0x30] sm:$0xff]  ;;  %v145_v15 = vld [vmem:[%s586_s30 + $0x38] sm:$0xff]  ;;  %s233_s28 = sshll.u32 %s602_s17, 4  ;;  %s219_s3 = scalar_lea.sflag [#allocation4], %s582_s23  ;;  %s638_s28 = int_to_ptr.vmem [resolvable:$true] %s233_s28 }
  0x38   : > { %v146_v16 = vld [vmem:[%s586_s30 + $0x40] sm:$0xff]  ;;  %186 = vst [vmem:[%s602_s17] sm:$0xff] %v154_v3  ;;  %187 = vst [vmem:[%s602_s17 + $0x8] sm:$0xff] %v155_v4  ;;  %v162_v17 = vunpack.c.l.bf16 %v142_v8  ;;  %v163_v18 = vunpack.c.h.bf16 %v142_v8  ;;  %v164_v19 = vunpack.c.l.bf16 %v143_v9  ;;  %v165_v20 = vunpack.c.h.bf16 %v143_v9  ;;  %v147_v21 = vld [vmem:[%s586_s30 + $0x48] sm:$0xff]  ;;  %s404_s4 = scalar_lea.vmem %s638_s28, 4096  ;;  %p702_p11 = scmp.ne.s32.totalorder %s698_s18, 0 }
  0x39   : > { %188 = vst [vmem:[%s602_s17 + $0x10] sm:$0xff] %v156_v5  ;;  %189 = vst [vmem:[%s602_s17 + $0x18] sm:$0xff] %v157_v6  ;;  %v148_v22 = vld [vmem:[%s586_s30 + $0x50] sm:$0xff]  ;;  %v149_v23 = vld [vmem:[%s586_s30 + $0x58] sm:$0xff]  ;;  %v166_v24 = vunpack.c.l.bf16 %v144_v14  ;;  %v167_v25 = vunpack.c.h.bf16 %v144_v14  ;;  %v168_v26 = vunpack.c.l.bf16 %v145_v15  ;;  %v169_v27 = vunpack.c.h.bf16 %v145_v15  ;;  %p405_p10 = scmp.ne.s32.totalorder %s638_s28, %s404_s4  ;;  %s473_s5 = smov [#allocation5]  }
  0x3a   : > { %190 = vst [vmem:[%s602_s17 + $0x20] sm:$0xff] %v158_v10  ;;  %191 = vst [vmem:[%s602_s17 + $0x28] sm:$0xff] %v159_v11  ;;  %v150_v28 = vld [vmem:[%s586_s30 + $0x60] sm:$0xff]  ;;  %v151_v29 = vld [vmem:[%s586_s30 + $0x68] sm:$0xff]  ;;  %v170_v30 = vunpack.c.l.bf16 %v146_v16  ;;  %v171_v31 = vunpack.c.h.bf16 %v146_v16  ;;  %v172_v32 = vunpack.c.l.bf16 %v147_v21  ;;  %v173_v33 = vunpack.c.h.bf16 %v147_v21  ;;  %s408_s11 = sshll.u32 %s473_s5, 4  ;;  %s409_s11 = int_to_ptr.vmem [resolvable:$false] %s408_s11 }
  0x3b   : > { %192 = vst [vmem:[%s602_s17 + $0x30] sm:$0xff] %v160_v12  ;;  %193 = vst [vmem:[%s602_s17 + $0x38] sm:$0xff] %v161_v13  ;;  %v152_v34 = vld [vmem:[%s586_s30 + $0x70] sm:$0xff]  ;;  %v153_v35 = vld [vmem:[%s586_s30 + $0x78] sm:$0xff]  ;;  %v174_v36 = vunpack.c.l.bf16 %v148_v22  ;;  %v175_v37 = vunpack.c.h.bf16 %v148_v22  ;;  %v176_v38 = vunpack.c.l.bf16 %v149_v23  ;;  %v177_v39 = vunpack.c.h.bf16 %v149_v23  ;;  %p406_p12 = pnand %p405_p10, %p702_p11  ;;  %s410_s13 = scalar_lea.vmem %s409_s11, 8192 }
  0x3c   : > { %194 = vst [vmem:[%s602_s17 + $0x40] sm:$0xff] %v162_v17  ;;  %195 = vst [vmem:[%s602_s17 + $0x48] sm:$0xff] %v163_v18  ;;  %v178_v40 = vunpack.c.l.bf16 %v150_v28  ;;  %v179_v41 = vunpack.c.h.bf16 %v150_v28  ;;  %v180_v42 = vunpack.c.l.bf16 %v151_v29  ;;  %v181_v43 = vunpack.c.h.bf16 %v151_v29  ;;  %p411_p5 = scmp.lt.s32.totalorder %s638_s28, %s409_s11  ;;  %p412_p7 = scmp.lt.s32.totalorder %s410_s13, %s404_s4 }
  0x3d   : > { %196 = vst [vmem:[%s602_s17 + $0x50] sm:$0xff] %v164_v19  ;;  %197 = vst [vmem:[%s602_s17 + $0x58] sm:$0xff] %v165_v20  ;;  %v182_v44 = vunpack.c.l.bf16 %v152_v34  ;;  %v183_v45 = vunpack.c.h.bf16 %v152_v34  ;;  %v184_v46 = vunpack.c.l.bf16 %v153_v35  ;;  %v185_v47 = vunpack.c.h.bf16 %v153_v35  ;;  %p407_p4 = pneg %p406_p12 }
  0x3e   : > { %198 = vst [vmem:[%s602_s17 + $0x60] sm:$0xff] %v166_v24  ;;  %199 = vst [vmem:[%s602_s17 + $0x68] sm:$0xff] %v167_v25  ;;  %p413_p8 = por %p412_p7, %p411_p5 }
  0x3f   : > { %200 = vst [vmem:[%s602_s17 + $0x70] sm:$0xff] %v168_v26  ;;  %201 = vst [vmem:[%s602_s17 + $0x78] sm:$0xff] %v169_v27 }
  0x40   : > { %202 = vst [vmem:[%s602_s17 + $0x80] sm:$0xff] %v170_v30  ;;  %203 = vst [vmem:[%s602_s17 + $0x88] sm:$0xff] %v171_v31  ;;  %p414_p9 = pnand %p413_p8, %p407_p4 }
  0x41   : > { %204 = vst [vmem:[%s602_s17 + $0x90] sm:$0xff] %v172_v32  ;;  %205 = vst [vmem:[%s602_s17 + $0x98] sm:$0xff] %v173_v33 }
  0x42   : > { %206 = vst [vmem:[%s602_s17 + $0xa0] sm:$0xff] %v174_v36  ;;  %207 = vst [vmem:[%s602_s17 + $0xa8] sm:$0xff] %v175_v37 }
  0x43   : > { %208 = vst [vmem:[%s602_s17 + $0xb0] sm:$0xff] %v176_v38  ;;  %209 = vst [vmem:[%s602_s17 + $0xb8] sm:$0xff] %v177_v39 }
  0x44   : > { %210 = vst [vmem:[%s602_s17 + $0xc0] sm:$0xff] %v178_v40  ;;  %211 = vst [vmem:[%s602_s17 + $0xc8] sm:$0xff] %v179_v41 }
  0x45   : > { %212 = vst [vmem:[%s602_s17 + $0xd0] sm:$0xff] %v180_v42  ;;  %213 = vst [vmem:[%s602_s17 + $0xd8] sm:$0xff] %v181_v43 }
  0x46   : > { %214 = vst [vmem:[%s602_s17 + $0xe0] sm:$0xff] %v182_v44  ;;  %215 = vst [vmem:[%s602_s17 + $0xe8] sm:$0xff] %v183_v45 }
  0x47   : > { %216 = vst [vmem:[%s602_s17 + $0xf0] sm:$0xff] %v184_v46  ;;  %217 = vst [vmem:[%s602_s17 + $0xf8] sm:$0xff] %v185_v47 }
  0x48   : > { %417 = shalt.err (!%p414_p9)
}
  0x49   : > { %s418_s14 = scalar_lea.hbm %s636_s2, 4096  ;;  %s422_s21 = scalar_lea.hbm %s693_s1, 32768 }
  0x4a   : > { %p419_p13 = scmp.ne.s32.totalorder %s636_s2, %s418_s14  ;;  %p423_p2 = scmp.lt.s32.totalorder %s636_s2, %s693_s1 }
  0x4b   : > { %p424_p3 = scmp.lt.s32.totalorder %s422_s21, %s418_s14 }
  0x4c   : > { %p420_p1 = pnand %p419_p13, %p702_p11 }
  0x4d   : > { %p425_p6 = por %p424_p3, %p423_p2 }
  0x4e   : > { %p421_p0 = pneg %p420_p1 }
  0x50   : > { %p426_p10 = pnand %p425_p6, %p421_p0 }
  0x52   : > { %429 = shalt.err (!%p426_p10)
}
  0x53   : > { %s474_s26 = smov 1024   ;;  %s475_s30 = smov 64  }
  0x54   : > { %328 = dma.vmem_to_hbm [thread:$0]  (%p702_p11), %s638_s28, 4096, %s636_s2, %s219_s3, %s474_s26, %s474_s26, %s475_s30  }
  0x55 PF: > { %p339_p12 = scmp.ge.s32.totalorder %s468_s9, 2  ;;  %s248_s25 = sand.u32 1, %s456_s6  }
  0x56   : > { %p703_p4 = scmp.ne.s32.totalorder %s699_s19, 0  ;;  %s249_s17 = scalar_lea.sflag [#allocation4], %s248_s25 }
  0x58   : > { %p335_p5 = pnand %p339_p12, %p703_p4 }
  0x5a   : > { %p336_p7 = pneg %p335_p5 }
  0x5c   : > { %451 = dma.done.wait (%p336_p7), %s249_s17, 4096  }
  0x5d   : > { %453 = vsyncadd (%p336_p7), %s249_s17, 4294963200  ;;  %p14_p8 = scmp.ge.s32.totalorder %s511_s12, 10   ;;  %s704_s6 = smov %s460_s7 }
  0x5e   : > { %s705_s7 = smov %s464_s8  ;;  %s706_s8 = smov %s523_s15 }
  0x5f   : > { %s707_s9 = smov %s511_s12  ;;  %16 = sbr.rel (!%p14_p8) target bundleno = 5 (0x5), region = 69 }
  0x64   :  { %254 = vsyncpa [#allocation3], 1 }
  0x65   :  { %256 = vsyncpa [#allocation3 + $0x1], 1 }
  0x66   :  { %257 = vsyncpa [#allocation4], 1 }
  0x67   :  { %259 = vsyncpa [#allocation4 + $0x1], 1 }

</bundles_post_ra>
